<compile_context>
chip_gen: v7x
topology: tpu7x:2x2x1
jax: 0.10.0
libtpu: 0.0.40
codegen_flags: <defaults>
</compile_context>

<pallas_src>
import functools
import math

import jax
import jax.numpy as jnp
from jax import lax
from jax.experimental import pallas as pl
from jax.experimental.pallas import tpu as pltpu


_VMEM_LIMIT = 48 * 1024 * 1024  # leaves headroom on v7x (64 MiB physical VMEM)


# ----------------------------------------------------------------------------
# Kernel 1: tiled, pipelined linear layer  out = x @ W + b
# ----------------------------------------------------------------------------
def _k_tile(din, target=512):
    """Largest K-tile <= target that evenly divides din (multiple of 128)."""
    if din <= target:
        return din
    for tk in range(target, 127, -128):
        if din % tk == 0:
            return tk
    return din  # no clean divisor: fall back to a single K step


def _linear_kernel(x_ref, w_ref, b_ref, o_ref, acc_ref, *, compute_dtype):
    k = pl.program_id(1)

    @pl.when(k == 0)
    def _():
        acc_ref[...] = jnp.zeros_like(acc_ref)

    acc_ref[...] += jnp.dot(
        x_ref[...].astype(compute_dtype),
        w_ref[...].astype(compute_dtype),
        preferred_element_type=jnp.float32,
    )

    @pl.when(k == pl.num_programs(1) - 1)
    def _():
        o_ref[...] = (acc_ref[...] + b_ref[...]).astype(o_ref.dtype)


def linear(x, w, b, *, tm=256, compute_dtype=jnp.float32):
    """x: (N, Din), w: (Din, Dout), b: (Dout,) -> (N, Dout)."""
    n, din = x.shape
    dout = w.shape[1]
    tm = min(n, tm)
    tk = _k_tile(din)
    grid = (pl.cdiv(n, tm), pl.cdiv(din, tk))
    b2 = b.reshape(1, dout)
    kernel = functools.partial(_linear_kernel, compute_dtype=compute_dtype)
    return pl.pallas_call(
        kernel,
        out_shape=jax.ShapeDtypeStruct((n, dout), x.dtype),
        grid_spec=pltpu.PrefetchScalarGridSpec(
            num_scalar_prefetch=0,
            grid=grid,
            in_specs=[
                pl.BlockSpec((tm, tk), lambda i, k: (i, k)),
                pl.BlockSpec((tk, dout), lambda i, k: (k, 0)),
                pl.BlockSpec((1, dout), lambda i, k: (0, 0)),
            ],
            out_specs=pl.BlockSpec((tm, dout), lambda i, k: (i, 0)),
            scratch_shapes=[pltpu.VMEM((tm, dout), jnp.float32)],
        ),
        compiler_params=pltpu.CompilerParams(
            dimension_semantics=("parallel", "arbitrary"),
            vmem_limit_bytes=_VMEM_LIMIT,
        ),
    )(x, w, b2)


# ----------------------------------------------------------------------------
# Kernel 2: scaled dot-product attention, all heads of one batch per grid step
# q/k/v arrive in folded (B, S, d_model) layout; heads are sliced in-kernel.
# ----------------------------------------------------------------------------
def _attention_kernel(*refs, nhead, d_k, scale, eps, has_mask, write_attn,
                      compute_dtype):
    it = iter(refs)
    q_ref, k_ref, v_ref = next(it), next(it), next(it)
    m_ref = next(it) if has_mask else None
    o_ref = next(it)
    attn_ref = next(it) if write_attn else None

    outs = []
    for h in range(nhead):
        lo = h * d_k
        # fold the 1/sqrt(d_k) scale into q (S*d_k mults, not S*S)
        q = (q_ref[0, :, lo:lo + d_k] * scale).astype(compute_dtype)   # (S, d_k)
        kh = k_ref[0, :, lo:lo + d_k].astype(compute_dtype)            # (S, d_k)
        vh = v_ref[0, :, lo:lo + d_k].astype(compute_dtype)            # (S, d_k)

        # q @ k^T without materializing a transpose of k
        scores = lax.dot_general(q, kh, (((1,), (1,)), ((), ())),
                                 preferred_element_type=jnp.float32)   # (S, S)
        if has_mask:
            # matches torch masked_fill(mask == 0, eps)
            scores = jnp.where(m_ref[0] == 0, eps, scores)

        # numerically stable softmax, stats in f32
        m = jnp.max(scores, axis=-1, keepdims=True)
        e = jnp.exp(scores - m)
        denom = jnp.sum(e, axis=-1, keepdims=True)
        p = e * pl.reciprocal(denom, approx=True)                      # (S, S)

        if write_attn:
            attn_ref[0, h] = p.astype(attn_ref.dtype)

        outs.append(jnp.dot(p.astype(compute_dtype), vh,
                            preferred_element_type=jnp.float32))       # (S, d_k)

    # single lane-dense (S, d_model) store instead of nhead narrow d_k stores
    o_ref[0] = jnp.concatenate(outs, axis=-1).astype(o_ref.dtype)


def attention(q, k, v, nhead, mask=None, *, return_attn=True,
              compute_dtype=jnp.float32, eps=1e-9):
    """q, k, v: (B, S, d_model) with heads folded in the last dim.

    Returns (out (B, S, d_model), attn (B, nhead, S, S) or None)."""
    b, s, d_model = q.shape
    d_k = d_model // nhead
    scale = 1.0 / math.sqrt(d_k)
    has_mask = mask is not None

    kernel = functools.partial(
        _attention_kernel, nhead=nhead, d_k=d_k, scale=scale, eps=eps,
        has_mask=has_mask, write_attn=return_attn, compute_dtype=compute_dtype)

    in_specs = [pl.BlockSpec((1, s, d_model), lambda i: (i, 0, 0))] * 3
    inputs = [q, k, v]
    if has_mask:
        in_specs.append(pl.BlockSpec((1, s, s), lambda i: (i, 0, 0)))
        inputs.append(mask)

    out_shape = [jax.ShapeDtypeStruct((b, s, d_model), q.dtype)]
    out_specs = [pl.BlockSpec((1, s, d_model), lambda i: (i, 0, 0))]
    if return_attn:
        out_shape.append(jax.ShapeDtypeStruct((b, nhead, s, s), q.dtype))
        out_specs.append(pl.BlockSpec((1, nhead, s, s), lambda i: (i, 0, 0, 0)))

    results = pl.pallas_call(
        kernel,
        out_shape=tuple(out_shape),
        grid=(b,),
        in_specs=in_specs,
        out_specs=tuple(out_specs),
        compiler_params=pltpu.CompilerParams(
            dimension_semantics=("parallel",),
            vmem_limit_bytes=_VMEM_LIMIT,
        ),
    )(*inputs)

    if return_attn:
        return results[0], results[1]
    return results[0], None


# ----------------------------------------------------------------------------
# MultiHeadAttention forward (no XLA transpose round-trips in the wrapper)
# ----------------------------------------------------------------------------
def multi_head_attention(params, query, key, value, nhead, mask=None, *,
                         return_attn=True, compute_dtype=jnp.float32):
    """query/key/value: (B, S, d_model); mask: optional (B, S, S) (0 = masked).

    Returns (out (B, S, d_model), attn (B, nhead, S, S) or None)."""
    b, s, d_model = query.shape
    wq, bq, wk, bk, wv, bv, wo, bo = params

    def project(x, w, bias):
        y = linear(x.reshape(b * s, d_model), w, bias,
                   compute_dtype=compute_dtype)
        return y.reshape(b, s, d_model)  # heads stay folded; no transposes

    q = project(query, wq, bq)
    k = project(key, wk, bk)
    v = project(value, wv, bv)

    x, attn = attention(q, k, v, nhead, mask=mask, return_attn=return_attn,
                        compute_dtype=compute_dtype)

    out = linear(x.reshape(b * s, d_model), wo, bo, compute_dtype=compute_dtype)
    return out.reshape(b, s, d_model), attn


# ----------------------------------------------------------------------------
# Reference (pure jnp) and init
# ----------------------------------------------------------------------------
def _reference_mha(params, query, key, value, nhead, mask=None, eps=1e-9):
    b, s, d_model = query.shape
    d_k = d_model // nhead
    wq, bq, wk, bk, wv, bv, wo, bo = params

    def proj(x, w, bias):
        y = x.reshape(b * s, d_model) @ w + bias
        return y.reshape(b, s, nhead, d_k).transpose(0, 2, 1, 3)

    q, k, v = proj(query, wq, bq), proj(key, wk, bk), proj(value, wv, bv)
    scores = jnp.einsum("bhqd,bhkd->bhqk", q, k) / math.sqrt(d_k)
    if mask is not None:
        scores = jnp.where(mask[:, None] == 0, eps, scores)
    p = jax.nn.softmax(scores, axis=-1)
    x = jnp.einsum("bhqk,bhkd->bhqd", p, v)
    x = x.transpose(0, 2, 1, 3).reshape(b * s, d_model)
    out = (x @ wo + bo).reshape(b, s, d_model)
    return out, p


def init_params(key, d_model):
    """Deterministic init mimicking nn.Linear (uniform(-1/sqrt(in), 1/sqrt(in)))."""
    bound = 1.0 / math.sqrt(d_model)
    keys = jax.random.split(key, 8)
    params = []
    for i in range(4):
        w = jax.random.uniform(keys[2 * i], (d_model, d_model),
                               minval=-bound, maxval=bound, dtype=jnp.float32)
        bias = jax.random.uniform(keys[2 * i + 1], (d_model,),
                                  minval=-bound, maxval=bound, dtype=jnp.float32)
        params += [w, bias]
    return tuple(params)


if __name__ == "__main__":
    B, S, D_MODEL, NHEAD = 2, 8, 32, 4

    root = jax.random.PRNGKey(0)
    kp, kq, kk, kv, km = jax.random.split(root, 5)

    params = init_params(kp, D_MODEL)
    query = jax.random.normal(kq, (B, S, D_MODEL), dtype=jnp.float32)
    key = jax.random.normal(kk, (B, S, D_MODEL), dtype=jnp.float32)
    value = jax.random.normal(kv, (B, S, D_MODEL), dtype=jnp.float32)

    # main path (mask=None, eval-mode dropout)
    out, attn = multi_head_attention(params, query, key, value, NHEAD)
    jax.block_until_ready((out, attn))
    assert out.shape == (B, S, D_MODEL)
    assert attn.shape == (B, NHEAD, S, S)

    ref_out, ref_attn = _reference_mha(params, query, key, value, NHEAD)
    assert jnp.allclose(out, ref_out, atol=1e-2, rtol=1e-2)
    assert jnp.allclose(attn, ref_attn, atol=1e-2, rtol=1e-2)

    # masked path
    mask = (jax.random.uniform(km, (B, S, S)) > 0.3).astype(jnp.int32)
    out_m, attn_m = multi_head_attention(params, query, key, value, NHEAD,
                                         mask=mask)
    jax.block_until_ready((out_m, attn_m))
    ref_out_m, ref_attn_m = _reference_mha(params, query, key, value, NHEAD,
                                           mask=mask)
    assert jnp.allclose(out_m, ref_out_m, atol=1e-2, rtol=1e-2)
    assert jnp.allclose(attn_m, ref_attn_m, atol=1e-2, rtol=1e-2)

    # attn-output-free path (avoids the O(S^2) HBM write when not needed)
    out_na, attn_na = multi_head_attention(params, query, key, value, NHEAD,
                                           return_attn=False)
    jax.block_until_ready(out_na)
    assert attn_na is None
    assert jnp.allclose(out_na, ref_out, atol=1e-2, rtol=1e-2)

    print("KERNEL_OK")
</pallas_src>

<mosaic_0001>
module attributes {stable_mosaic.version = 11 : i64} {
  func.func @_linear_kernel(%arg0: i32, %arg1: i32, %arg2: memref<16x32xf32, #tpu.memory_space<vmem>>, %arg3: memref<32x32xf32, #tpu.memory_space<vmem>>, %arg4: memref<1x32xf32, #tpu.memory_space<vmem>>, %arg5: memref<16x32xf32, #tpu.memory_space<vmem>>, %arg6: memref<16x32xf32, #tpu.memory_space<vmem>>) attributes {dimension_semantics = [#tpu.dimension_semantics<parallel>, #tpu.dimension_semantics<arbitrary>], iteration_bounds = array<i64: 1, 1>, scalar_prefetch = 0 : i64, scratch_operands = 1 : i64, tpu.core_type = #tpu.core_type<tc>, window_params = [{transform_indices = @transform_0, window_bounds = array<i64: 16, 32>}, {transform_indices = @transform_1, window_bounds = array<i64: 32, 32>}, {pipeline_mode = #tpu.pipeline_mode<synchronous>, transform_indices = @transform_2, window_bounds = array<i64: 1, 32>}, {transform_indices = @transform_3, window_bounds = array<i64: 16, 32>}]} {
    %c0_i32 = arith.constant 0 : i32
    %0 = arith.cmpi eq, %arg1, %c0_i32 : i32
    %1 = arith.extui %0 : i1 to i32
    %c0_i32_0 = arith.constant 0 : i32
    %2 = arith.cmpi ne, %1, %c0_i32_0 : i32
    scf.if %2 {
      %cst_10 = arith.constant 0.000000e+00 : f32
      %12 = vector.broadcast %cst_10 : f32 to vector<16x32xf32>
      %c0_11 = arith.constant 0 : index
      %c0_12 = arith.constant 0 : index
      %13 = vector.load %arg6[%c0_11, %c0_12] : memref<16x32xf32, #tpu.memory_space<vmem>>, vector<16x32xf32>
      tpu.vector_store %arg6[%c0_11, %c0_12], %12 {strides = array<i32>} : memref<16x32xf32, #tpu.memory_space<vmem>>, vector<16x32xf32>,
    } else {
    }
    %c0 = arith.constant 0 : index
    %c0_1 = arith.constant 0 : index
    %3 = vector.load %arg6[%c0, %c0_1] : memref<16x32xf32, #tpu.memory_space<vmem>>, vector<16x32xf32>
    %c0_2 = arith.constant 0 : index
    %c0_3 = arith.constant 0 : index
    %4 = vector.load %arg2[%c0_2, %c0_3] : memref<16x32xf32, #tpu.memory_space<vmem>>, vector<16x32xf32>
    %c0_4 = arith.constant 0 : index
    %c0_5 = arith.constant 0 : index
    %5 = vector.load %arg3[%c0_4, %c0_5] : memref<32x32xf32, #tpu.memory_space<vmem>>, vector<32x32xf32>
    %cst = arith.constant dense<0.000000e+00> : vector<16x32xf32>
    %6 = tpu.matmul %4, %5, %cst {dimension_numbers = #tpu.dot_dimension_numbers<[1], [0], [0], [1], [0, 0, 1, 1], [], []>} : vector<16x32xf32>, vector<32x32xf32>, vector<16x32xf32> -> vector<16x32xf32>
    %7 = arith.addf %3, %6 : vector<16x32xf32>
    %c0_6 = arith.constant 0 : index
    %c0_7 = arith.constant 0 : index
    %8 = vector.load %arg6[%c0_6, %c0_7] : memref<16x32xf32, #tpu.memory_space<vmem>>, vector<16x32xf32>
    tpu.vector_store %arg6[%c0_6, %c0_7], %7 {strides = array<i32>} : memref<16x32xf32, #tpu.memory_space<vmem>>, vector<16x32xf32>,
    %c0_i32_8 = arith.constant 0 : i32
    %9 = arith.cmpi eq, %arg1, %c0_i32_8 : i32
    %10 = arith.extui %9 : i1 to i32
    %c0_i32_9 = arith.constant 0 : i32
    %11 = arith.cmpi ne, %10, %c0_i32_9 : i32
    scf.if %11 {
      %c0_10 = arith.constant 0 : index
      %c0_11 = arith.constant 0 : index
      %12 = vector.load %arg6[%c0_10, %c0_11] : memref<16x32xf32, #tpu.memory_space<vmem>>, vector<16x32xf32>
      %c0_12 = arith.constant 0 : index
      %c0_13 = arith.constant 0 : index
      %13 = vector.load %arg4[%c0_12, %c0_13] : memref<1x32xf32, #tpu.memory_space<vmem>>, vector<1x32xf32>
      %14 = vector.broadcast %13 : vector<1x32xf32> to vector<16x32xf32>
      %15 = arith.addf %12, %14 : vector<16x32xf32>
      %c0_14 = arith.constant 0 : index
      %c0_15 = arith.constant 0 : index
      %16 = vector.load %arg5[%c0_14, %c0_15] : memref<16x32xf32, #tpu.memory_space<vmem>>, vector<16x32xf32>
      tpu.vector_store %arg5[%c0_14, %c0_15], %15 {strides = array<i32>} : memref<16x32xf32, #tpu.memory_space<vmem>>, vector<16x32xf32>,
    } else {
    }
    return
  }
  func.func @transform_0(%arg0: i32, %arg1: i32) -> (i32, i32) {
    %c0_i32 = arith.constant 0 : i32
    return %arg0, %arg1 : i32, i32
  }
  func.func @transform_1(%arg0: i32, %arg1: i32) -> (i32, i32) {
    %c0_i32 = arith.constant 0 : i32
    %c0_i32_0 = arith.constant 0 : i32
    return %arg1, %c0_i32 : i32, i32
  }
  func.func @transform_2(%arg0: i32, %arg1: i32) -> (i32, i32) {
    %c0_i32 = arith.constant 0 : i32
    %c0_i32_0 = arith.constant 0 : i32
    %c0_i32_1 = arith.constant 0 : i32
    return %c0_i32, %c0_i32_0 : i32, i32
  }
  func.func @transform_3(%arg0: i32, %arg1: i32) -> (i32, i32) {
    %c0_i32 = arith.constant 0 : i32
    %c0_i32_0 = arith.constant 0 : i32
    return %arg0, %c0_i32 : i32, i32
  }
}

</mosaic_0001>

<bundles_post_ra>
// kernel: tpu_custom_call.1
= control target key start
LH: loop header
LB: loop body
LE: loop exit
PB: predicated region body
PF: predicated region fallthrough
CT: control target
= control target key end

     0   :  { %8 = vsyncpa [#allocation4], 0  ;;  %s366_s0 = inlined_call_operand.hbm [shape: f32[16,32], index: 0, kind: input, shape index: {}]   ;;  %s367_s1 = inlined_call_operand.hbm [shape: f32[32,32], index: 1, kind: input, shape index: {}]   ;;  %s368_s2 = inlined_call_operand.vmem [shape: f32[1,32], index: 2, kind: input, shape index: {}]   ;;  %s369_s3 = inlined_call_operand.hbm [shape: f32[16,32], index: 3, kind: output, shape index: {}]  }
   0x1   :  { %9 = vsyncpa [#allocation7], 0 }
   0x2   :  { %10 = vsyncpa [#allocation5], 0  ;;  %s284_s12 = smov [#allocation3]   ;;  %s212_s16 = scalar_lea.hbm %s366_s0, 256 }
   0x3   :  { %s16_s13 = sshll.u32 %s284_s12, 4  ;;  %p213_p0 = scmp.ne.s32.totalorder %s366_s0, %s212_s16  ;;  %s17_s13 = int_to_ptr.vmem [resolvable:$true] %s16_s13 }
   0x4   :  { %p216_p1 = scmp.lt.u32.totalorder %s212_s16, %s366_s0 }
   0x6   :  { %p218_p2 = pnand %p216_p1, %p213_p0 }
   0x8   :  { %221 = shalt.err (!%p218_p2)
}
   0x9   :  { %s222_s21 = scalar_lea.vmem %s17_s13, 256  ;;  %p227_p4 = scmp.lt.s32.totalorder %s17_s13, %s17_s13 }
   0xa   :  { %p223_p3 = scmp.ne.s32.totalorder %s17_s13, %s222_s21  ;;  %p228_p5 = scmp.lt.s32.totalorder %s222_s21, %s222_s21 }
   0xc   :  { %p229_p6 = por %p228_p5, %p227_p4 }
   0xe   :  { %p230_p7 = pnand %p229_p6, %p223_p3 }
  0x10   :  { %233 = shalt.err (!%p230_p7)
}
  0x11   :  { %s285_s22 = smov 128   ;;  %s286_s23 = smov 8  }
  0x12   :  { %22 = dma.hbm_to_vmem [thread:$0]  %s366_s0, 256, %s17_s13, [#allocation4], %s285_s22, %s285_s22, %s286_s23  }
  0x13   :  { %s287_s26 = smov [#allocation6]   ;;  %s234_s30 = scalar_lea.hbm %s367_s1, 512 }
  0x14   :  { %s28_s27 = sshll.u32 %s287_s26, 4  ;;  %p235_p8 = scmp.ne.s32.totalorder %s367_s1, %s234_s30  ;;  %s29_s27 = int_to_ptr.vmem [resolvable:$true] %s28_s27 }
  0x15   :  { %p238_p9 = scmp.lt.u32.totalorder %s234_s30, %s367_s1 }
  0x17   :  { %p240_p10 = pnand %p238_p9, %p235_p8 }
  0x19   :  { %243 = shalt.err (!%p240_p10)
}
  0x1a   :  { %s244_s8 = scalar_lea.vmem %s29_s27, 512  ;;  %p249_p12 = scmp.lt.s32.totalorder %s29_s27, %s29_s27 }
  0x1b   :  { %p245_p11 = scmp.ne.s32.totalorder %s29_s27, %s244_s8  ;;  %p250_p13 = scmp.lt.s32.totalorder %s244_s8, %s244_s8 }
  0x1d   :  { %p251_p0 = por %p250_p13, %p249_p12 }
  0x1f   :  { %p252_p1 = pnand %p251_p0, %p245_p11 }
  0x21   :  { %255 = shalt.err (!%p252_p1)
}
  0x22   :  { %34 = dma.hbm_to_vmem [thread:$0]  %s367_s1, 512, %s29_s27, [#allocation7], %s285_s22, %s285_s22, %s286_s23  }
  0x23   :  { %278 = dma.done.wait [#allocation4], 256  }
  0x24   :  { %279 = vsyncadd [#allocation4], 4294967040 }
  0x25   :  { %280 = dma.done.wait [#allocation7], 512  }
  0x26   :  { %281 = vsyncadd [#allocation7], 4294966784  ;;  %vm47_vm0 = vcmask 261120   ;;  %v288_v0 = vmov 0.0   ;;  %v54_v1 = vld [vmem:[#allocation6] sm:$0xff]  ;;  %v55_v2 = vld [vmem:[#allocation6 + $0x8] sm:$0xff] }
  0x27   :  { %49 = vst.msk [vmem:[#allocation2 + $0x8] sm:$0xff] %vm47_vm0, %v288_v0  ;;  %48 = vst.msk [vmem:[#allocation2] sm:$0xff] %vm47_vm0, %v288_v0  ;;  %v56_v3 = vld [vmem:[#allocation6 + $0x10] sm:$0xff]  ;;  %v198_v4 = vpack.c.bf16 %v55_v2, %v54_v1  ;;  %v57_v5 = vld [vmem:[#allocation6 + $0x18] sm:$0xff]  ;;  %s289_s11 = smov [#allocation8]  }
  0x28   :  { %v52_v6 = vld [vmem:[#allocation3] sm:$0xff]  ;;  %v202_v7 = vpack.c.bf16 %v57_v5, %v56_v3  ;;  %v53_v8 = vld [vmem:[#allocation3 + $0x8] sm:$0xff]  ;;  %v180_v15 = vld [vmem:[%s368_s2] ss:$0 sm:$0xff]  ;;  %s165_s12 = sshll.u32 %s289_s11, 4  ;;  %s166_s12 = int_to_ptr.vmem [resolvable:$true] %s165_s12 }
  0x29   :  { %195 = vmatprep.mubr.msk.f32.mxu0 %vm47_vm0, %v52_v6  ;;  %199 = vmatprep.subr.bf16.mxu0 %v198_v4  ;;  %s256_s13 = scalar_lea.vmem %s166_s12, 256  ;;  %p261_p3 = scmp.lt.s32.totalorder %s166_s12, %s166_s12 }
  0x2a   :  { %201 = vmatpush3.bf16.msra.mxu0 %v198_v4  ;;  %p257_p2 = scmp.ne.s32.totalorder %s166_s12, %s256_s13  ;;  %p262_p4 = scmp.lt.s32.totalorder %s256_s13, %s256_s13 }
  0x2b   :  { %203 = vmatprep.subr.bf16.mxu0 %v202_v7 }
  0x2c   :  { %p263_p5 = por %p262_p4, %p261_p3 }
  0x2e   :  { %205 = vmatpush3.bf16.msra.mxu0 %v202_v7  ;;  %v51_v9 = vld [vmem:[#allocation2 + $0x8] sm:$0xff]  ;;  %v50_v10 = vld [vmem:[#allocation2] sm:$0xff]  ;;  %p264_p6 = pnand %p263_p5, %p257_p2 }
  0x31   :  { %196 = vmatmul.mubr.msk.f32.vlgmr.msra.gmra.mrb[0].mxu0 %vm47_vm0, %v53_v8 }
 0x104   :  { %v197_v11 = vpop.f32.mrb[0].mxu0 }
 0x105   :  { %v141_v12 = vadd.f32 %v197_v11, %v51_v9  ;;  %v131_v13 = vpop.f32.mrb[1].mxu0 }
 0x106   :  { %v140_v14 = vadd.f32 %v131_v13, %v50_v10 }
 0x107   :  { %143 = vst.msk [vmem:[#allocation2 + $0x8] sm:$0xff] %vm47_vm0, %v141_v12 }
 0x108   :  { %142 = vst.msk [vmem:[#allocation2] sm:$0xff] %vm47_vm0, %v140_v14 }
 0x10e   :  { %v148_v16 = vld [vmem:[#allocation2 + $0x8] sm:$0xff] }
 0x10f   :  { %v147_v17 = vld [vmem:[#allocation2] sm:$0xff]  ;;  %v157_v18 = vadd.f32 %v180_v15, %v148_v16 }
 0x110   :  { %v156_v19 = vadd.f32 %v180_v15, %v147_v17 }
 0x111   :  { %159 = vst.msk [vmem:[#allocation8 + $0x8] sm:$0xff] %vm47_vm0, %v157_v18 }
 0x112   :  { %158 = vst.msk [vmem:[#allocation8] sm:$0xff] %vm47_vm0, %v156_v19 }
 0x113   :  { %267 = shalt.err (!%p264_p6)
}
 0x114   :  { %s268_s15 = scalar_lea.hbm %s369_s3, 256 }
 0x115   :  { %p269_p7 = scmp.ne.s32.totalorder %s369_s3, %s268_s15  ;;  %p272_p8 = scmp.lt.u32.totalorder %s268_s15, %s369_s3 }
 0x117   :  { %p274_p9 = pnand %p272_p8, %p269_p7 }
 0x119   :  { %277 = shalt.err (!%p274_p9)
}
 0x11a   :  { %171 = dma.vmem_to_hbm [thread:$0]  %s166_s12, 256, %s369_s3, [#allocation5], %s285_s22, %s285_s22, %s286_s23  }
 0x11b   :  { %282 = dma.done.wait [#allocation5], 256  }
 0x11c   :  { %283 = vsyncadd [#allocation5], 4294967040 }
 0x11d   :  { %175 = vsyncpa [#allocation4], 1 }
 0x11e   :  { %176 = vsyncpa [#allocation7], 1 }
 0x11f   :  { %177 = vsyncpa [#allocation5], 1 }

</bundles_post_ra>
